<compile_context>
chip_gen: v6e
topology: v6e:2x2x1
jax: 0.10.0
libtpu: 0.0.40
codegen_flags: <defaults>
</compile_context>

<pallas_src>
import functools

import jax
import jax.numpy as jnp
from jax import lax
from jax.experimental import pallas as pl
from jax.experimental.pallas import tpu as pltpu


# ---------------------------------------------------------------------------
# Fused kernel: embedding gather (cond_module) + _StatsHead MLP + exp(log_sigma)
# ---------------------------------------------------------------------------
def _normalizer_kernel(t_dims, idx_ref, emb_ref, w123_ref, b123_ref,
                       w4_ref, b4_ref, out_ref):
    """One grid step processes a (TB, :) row-block of the batch."""
    n_tables = idx_ref.shape[0]
    tb = out_ref.shape[0]
    v_total = emb_ref.shape[0]

    # --- cond_module: sum of per-variable embedding rows, done as a multi-hot
    #     matmul on the MXU (fully vectorized over the tile, no dynamic indexing).
    #     TODO(synk): for large vocabularies replace with a DMA row gather.
    vocab_iota = lax.broadcasted_iota(jnp.int32, (tb, v_total), 1)
    multi_hot = jnp.zeros((tb, v_total), jnp.float32)
    for t_i in range(n_tables):
        idx_t = idx_ref[t_i]                                # (TB, 1) int32
        multi_hot = multi_hot + (idx_t == vocab_iota).astype(jnp.float32)
    z = jnp.dot(multi_hot, emb_ref[...],
                preferred_element_type=jnp.float32)         # (TB, E)

    # --- _StatsHead: 3 x (Linear + ReLU), then final Linear -> (TB, out_dim)
    h = z
    for k in range(w123_ref.shape[0]):
        h = jnp.dot(h, w123_ref[k],
                    preferred_element_type=jnp.float32) + b123_ref[k:k + 1, :]
        h = jnp.maximum(h, 0.0)
    out = jnp.dot(h, w4_ref[...],
                  preferred_element_type=jnp.float32) + b4_ref[...]

    # sigma = exp(log_sigma): apply exp only to columns [T, 2T) via a lane mask so
    # the whole result is still written with a single dense store.
    col = lax.broadcasted_iota(jnp.int32, out.shape, 1)
    is_log_sigma = (col >= t_dims) & (col < 2 * t_dims)
    out_ref[...] = jnp.where(is_log_sigma, jnp.exp(out), out)


# ---------------------------------------------------------------------------
# Wrapper: packing + pallas_call + output split
# ---------------------------------------------------------------------------
def normalizer_forward(cat_vars_dict, emb_tables, params, time_series_dims,
                       do_scale, batch_block=256):
    names = sorted(cat_vars_dict.keys())

    # Pack the per-variable embedding tables into one (V_total, E) matrix and
    # turn the per-variable indices into global row ids (cheap XLA glue).
    tables = [emb_tables[n] for n in names]
    emb = jnp.concatenate(tables, axis=0)
    offsets, acc = [], 0
    for tab in tables:
        offsets.append(acc)
        acc += tab.shape[0]
    idx = jnp.stack([cat_vars_dict[n].astype(jnp.int32) + off
                     for n, off in zip(names, offsets)], axis=0)   # (n_tables, B)

    bsz = idx.shape[1]
    hid = params["w1"].shape[1]
    out_dim = params["w4"].shape[1]
    # TODO(synk): packing w1 with w2/w3 requires embedding_dim == hidden_dim;
    #             keep w1 as a separate input if that ever differs.
    assert params["w1"].shape[0] == hid, "embedding_dim must equal hidden_dim"

    w123 = jnp.stack([params["w1"], params["w2"], params["w3"]], axis=0)        # (3,H,H)
    b123 = jnp.concatenate([params["b1"], params["b2"], params["b3"]], axis=0)  # (3,H)
    w4, b4 = params["w4"], params["b4"]

    # Row tiling: one full block at small B; 256-row blocks (parallel across the
    # two TensorCores on v7x) once the batch is large enough to amortize.
    tb = bsz if bsz <= batch_block else batch_block
    n_blocks = -(-bsz // tb)
    b_pad = n_blocks * tb
    if b_pad != bsz:
        idx = jnp.pad(idx, ((0, 0), (0, b_pad - bsz)))
    idx3 = idx[:, :, None]                                   # (n_tables, B_pad, 1)
    n_tables = idx3.shape[0]

    kernel = functools.partial(_normalizer_kernel, time_series_dims)

    packed = pl.pallas_call(
        kernel,
        out_shape=jax.ShapeDtypeStruct((b_pad, out_dim), jnp.float32),
        grid=(n_blocks,),
        in_specs=[
            pl.BlockSpec((n_tables, tb, 1), lambda i: (0, i, 0)),   # indices
            pl.BlockSpec(emb.shape, lambda i: (0, 0)),              # packed emb table
            pl.BlockSpec(w123.shape, lambda i: (0, 0, 0)),          # hidden weights
            pl.BlockSpec(b123.shape, lambda i: (0, 0)),             # hidden biases
            pl.BlockSpec(w4.shape, lambda i: (0, 0)),               # head weight
            pl.BlockSpec(b4.shape, lambda i: (0, 0)),               # head bias
        ],
        out_specs=pl.BlockSpec((tb, out_dim), lambda i: (i, 0)),
        compiler_params=pltpu.CompilerParams(
            dimension_semantics=("parallel",)),
    )(idx3, emb, w123, b123, w4, b4)

    packed = packed[:bsz]
    t = time_series_dims
    mu = packed[:, 0:t]
    sigma = packed[:, t:2 * t]          # exp already applied in-kernel
    if do_scale:
        return mu, sigma, packed[:, 2 * t:3 * t], packed[:, 3 * t:4 * t]
    return mu, sigma, None, None


# ---------------------------------------------------------------------------
# Reference cond_module (plain JAX, used only for the correctness check)
# ---------------------------------------------------------------------------
def cond_module_forward(cat_vars_dict, emb_tables):
    embs = []
    for name in sorted(cat_vars_dict.keys()):
        idx = cat_vars_dict[name]
        embs.append(jnp.take(emb_tables[name], idx, axis=0))
    return functools.reduce(lambda a, b: a + b, embs), None


# ---------------------------------------------------------------------------
# Parameter construction (deterministic)
# ---------------------------------------------------------------------------
def make_params(key, embedding_dim, hidden_dim, time_series_dims, do_scale,
                vocab_sizes):
    out_dim = (4 if do_scale else 2) * time_series_dims
    keys = jax.random.split(key, 16)
    k = iter(keys)

    def lin(kw, kb, fan_in, fan_out):
        # PyTorch Linear default init: U(-1/sqrt(fan_in), 1/sqrt(fan_in))
        bound = 1.0 / jnp.sqrt(fan_in)
        w = jax.random.uniform(kw, (fan_in, fan_out), jnp.float32, -bound, bound)
        b = jax.random.uniform(kb, (1, fan_out), jnp.float32, -bound, bound)
        return w, b

    params = {}
    params["w1"], params["b1"] = lin(next(k), next(k), embedding_dim, hidden_dim)
    params["w2"], params["b2"] = lin(next(k), next(k), hidden_dim, hidden_dim)
    params["w3"], params["b3"] = lin(next(k), next(k), hidden_dim, hidden_dim)
    params["w4"], params["b4"] = lin(next(k), next(k), hidden_dim, out_dim)

    emb_tables = {}
    for name, vocab in sorted(vocab_sizes.items()):
        emb_tables[name] = jax.random.normal(next(k), (vocab, embedding_dim),
                                             jnp.float32) * 0.1
    return params, emb_tables


# ---------------------------------------------------------------------------
if __name__ == "__main__":
    BATCH = 2
    EMBEDDING_DIM = 32
    HIDDEN_DIM = 32
    TIME_SERIES_DIMS = 4
    VOCAB_SIZES = {"day": 7, "month": 12, "region": 5}

    root = jax.random.PRNGKey(0)
    k_params, k_data = jax.random.split(root)

    cat_vars_dict = {}
    for i, (name, vocab) in enumerate(sorted(VOCAB_SIZES.items())):
        kk = jax.random.fold_in(k_data, i)
        cat_vars_dict[name] = jax.random.randint(kk, (BATCH,), 0, vocab,
                                                 dtype=jnp.int32)

    for do_scale in (True, False):
        params, emb_tables = make_params(k_params, EMBEDDING_DIM, HIDDEN_DIM,
                                         TIME_SERIES_DIMS, do_scale, VOCAB_SIZES)

        mu, sigma, z_min, z_max = normalizer_forward(
            cat_vars_dict, emb_tables, params, TIME_SERIES_DIMS, do_scale)
        jax.block_until_ready((mu, sigma))

        # pure-JAX reference
        z_ref, _ = cond_module_forward(cat_vars_dict, emb_tables)
        h = jnp.maximum(z_ref @ params["w1"] + params["b1"], 0.0)
        h = jnp.maximum(h @ params["w2"] + params["b2"], 0.0)
        h = jnp.maximum(h @ params["w3"] + params["b3"], 0.0)
        out_ref = h @ params["w4"] + params["b4"]
        n_chunks = 4 if do_scale else 2
        out_ref = out_ref.reshape(BATCH, n_chunks, TIME_SERIES_DIMS)

        assert jnp.allclose(mu, out_ref[:, 0, :], atol=1e-4, rtol=1e-4)
        assert jnp.allclose(sigma, jnp.exp(out_ref[:, 1, :]), atol=1e-4, rtol=1e-4)
        if do_scale:
            assert jnp.allclose(z_min, out_ref[:, 2, :], atol=1e-4, rtol=1e-4)
            assert jnp.allclose(z_max, out_ref[:, 3, :], atol=1e-4, rtol=1e-4)
        else:
            assert z_min is None and z_max is None

    print("KERNEL_OK")
</pallas_src>

<mosaic_0001>
module attributes {stable_mosaic.version = 11 : i64} {
  func.func @_normalizer_kernel(%arg0: i32, %arg1: memref<3x2x1xi32, #tpu.memory_space<vmem>>, %arg2: memref<24x32xf32, #tpu.memory_space<vmem>>, %arg3: memref<3x32x32xf32, #tpu.memory_space<vmem>>, %arg4: memref<3x32xf32, #tpu.memory_space<vmem>>, %arg5: memref<32x16xf32, #tpu.memory_space<vmem>>, %arg6: memref<1x16xf32, #tpu.memory_space<vmem>>, %arg7: memref<2x16xf32, #tpu.memory_space<vmem>>) attributes {dimension_semantics = [#tpu.dimension_semantics<parallel>], iteration_bounds = array<i64: 1>, scalar_prefetch = 0 : i64, scratch_operands = 0 : i64, tpu.core_type = #tpu.core_type<tc>, window_params = [{transform_indices = @transform_0, window_bounds = array<i64: 3, 2, 1>}, {pipeline_mode = #tpu.pipeline_mode<synchronous>, transform_indices = @transform_1, window_bounds = array<i64: 24, 32>}, {pipeline_mode = #tpu.pipeline_mode<synchronous>, transform_indices = @transform_2, window_bounds = array<i64: 3, 32, 32>}, {pipeline_mode = #tpu.pipeline_mode<synchronous>, transform_indices = @transform_3, window_bounds = array<i64: 3, 32>}, {pipeline_mode = #tpu.pipeline_mode<synchronous>, transform_indices = @transform_4, window_bounds = array<i64: 32, 16>}, {pipeline_mode = #tpu.pipeline_mode<synchronous>, transform_indices = @transform_5, window_bounds = array<i64: 1, 16>}, {transform_indices = @transform_6, window_bounds = array<i64: 2, 16>}]} {
    %0 = tpu.iota {dimensions = array<i32: 1>} : vector<2x24xi32>
    %cst = arith.constant 0.000000e+00 : f32
    %1 = vector.broadcast %cst : f32 to vector<2x24xf32>
    %c0 = arith.constant 0 : index
    %c0_0 = arith.constant 0 : index
    %c0_1 = arith.constant 0 : index
    %2 = vector.load %arg1[%c0, %c0_0, %c0_1] : memref<3x2x1xi32, #tpu.memory_space<vmem>>, vector<1x2x1xi32>
    %3 = vector.shape_cast %2 : vector<1x2x1xi32> to vector<2x1xi32>
    %4 = vector.broadcast %3 : vector<2x1xi32> to vector<2x24xi32>
    %5 = arith.cmpi eq, %4, %0 : vector<2x24xi32>
    %6 = arith.extui %5 : vector<2x24xi1> to vector<2x24xi32>
    %7 = arith.sitofp %6 : vector<2x24xi32> to vector<2x24xf32>
    %8 = arith.addf %1, %7 : vector<2x24xf32>
    %c1 = arith.constant 1 : index
    %c0_2 = arith.constant 0 : index
    %c0_3 = arith.constant 0 : index
    %9 = vector.load %arg1[%c1, %c0_2, %c0_3] : memref<3x2x1xi32, #tpu.memory_space<vmem>>, vector<1x2x1xi32>
    %10 = vector.shape_cast %9 : vector<1x2x1xi32> to vector<2x1xi32>
    %11 = vector.broadcast %10 : vector<2x1xi32> to vector<2x24xi32>
    %12 = arith.cmpi eq, %11, %0 : vector<2x24xi32>
    %13 = arith.extui %12 : vector<2x24xi1> to vector<2x24xi32>
    %14 = arith.sitofp %13 : vector<2x24xi32> to vector<2x24xf32>
    %15 = arith.addf %8, %14 : vector<2x24xf32>
    %c2 = arith.constant 2 : index
    %c0_4 = arith.constant 0 : index
    %c0_5 = arith.constant 0 : index
    %16 = vector.load %arg1[%c2, %c0_4, %c0_5] : memref<3x2x1xi32, #tpu.memory_space<vmem>>, vector<1x2x1xi32>
    %17 = vector.shape_cast %16 : vector<1x2x1xi32> to vector<2x1xi32>
    %18 = vector.broadcast %17 : vector<2x1xi32> to vector<2x24xi32>
    %19 = arith.cmpi eq, %18, %0 : vector<2x24xi32>
    %20 = arith.extui %19 : vector<2x24xi1> to vector<2x24xi32>
    %21 = arith.sitofp %20 : vector<2x24xi32> to vector<2x24xf32>
    %22 = arith.addf %15, %21 : vector<2x24xf32>
    %c0_6 = arith.constant 0 : index
    %c0_7 = arith.constant 0 : index
    %23 = vector.load %arg2[%c0_6, %c0_7] : memref<24x32xf32, #tpu.memory_space<vmem>>, vector<24x32xf32>
    %cst_8 = arith.constant dense<0.000000e+00> : vector<2x32xf32>
    %24 = tpu.matmul %22, %23, %cst_8 {dimension_numbers = #tpu.dot_dimension_numbers<[1], [0], [0], [1], [0, 0, 1, 1], [], []>} : vector<2x24xf32>, vector<24x32xf32>, vector<2x32xf32> -> vector<2x32xf32>
    %c0_9 = arith.constant 0 : index
    %c0_10 = arith.constant 0 : index
    %c0_11 = arith.constant 0 : index
    %25 = vector.load %arg3[%c0_9, %c0_10, %c0_11] : memref<3x32x32xf32, #tpu.memory_space<vmem>>, vector<1x32x32xf32>
    %26 = vector.shape_cast %25 : vector<1x32x32xf32> to vector<32x32xf32>
    %cst_12 = arith.constant dense<0.000000e+00> : vector<2x32xf32>
    %27 = tpu.matmul %24, %26, %cst_12 {dimension_numbers = #tpu.dot_dimension_numbers<[1], [0], [0], [1], [0, 0, 1, 1], [], []>} : vector<2x32xf32>, vector<32x32xf32>, vector<2x32xf32> -> vector<2x32xf32>
    %c0_13 = arith.constant 0 : index
    %c0_14 = arith.constant 0 : index
    %28 = vector.load %arg4[%c0_13, %c0_14] : memref<3x32xf32, #tpu.memory_space<vmem>>, vector<1x32xf32>
    %29 = vector.broadcast %28 : vector<1x32xf32> to vector<2x32xf32>
    %30 = arith.addf %27, %29 : vector<2x32xf32>
    %cst_15 = arith.constant 0.000000e+00 : f32
    %31 = vector.broadcast %cst_15 : f32 to vector<2x32xf32>
    %32 = arith.maximumf %30, %31 : vector<2x32xf32>
    %c1_16 = arith.constant 1 : index
    %c0_17 = arith.constant 0 : index
    %c0_18 = arith.constant 0 : index
    %33 = vector.load %arg3[%c1_16, %c0_17, %c0_18] : memref<3x32x32xf32, #tpu.memory_space<vmem>>, vector<1x32x32xf32>
    %34 = vector.shape_cast %33 : vector<1x32x32xf32> to vector<32x32xf32>
    %cst_19 = arith.constant dense<0.000000e+00> : vector<2x32xf32>
    %35 = tpu.matmul %32, %34, %cst_19 {dimension_numbers = #tpu.dot_dimension_numbers<[1], [0], [0], [1], [0, 0, 1, 1], [], []>} : vector<2x32xf32>, vector<32x32xf32>, vector<2x32xf32> -> vector<2x32xf32>
    %c1_20 = arith.constant 1 : index
    %c0_21 = arith.constant 0 : index
    %36 = vector.load %arg4[%c1_20, %c0_21] : memref<3x32xf32, #tpu.memory_space<vmem>>, vector<1x32xf32>
    %37 = vector.broadcast %36 : vector<1x32xf32> to vector<2x32xf32>
    %38 = arith.addf %35, %37 : vector<2x32xf32>
    %cst_22 = arith.constant 0.000000e+00 : f32
    %39 = vector.broadcast %cst_22 : f32 to vector<2x32xf32>
    %40 = arith.maximumf %38, %39 : vector<2x32xf32>
    %c2_23 = arith.constant 2 : index
    %c0_24 = arith.constant 0 : index
    %c0_25 = arith.constant 0 : index
    %41 = vector.load %arg3[%c2_23, %c0_24, %c0_25] : memref<3x32x32xf32, #tpu.memory_space<vmem>>, vector<1x32x32xf32>
    %42 = vector.shape_cast %41 : vector<1x32x32xf32> to vector<32x32xf32>
    %cst_26 = arith.constant dense<0.000000e+00> : vector<2x32xf32>
    %43 = tpu.matmul %40, %42, %cst_26 {dimension_numbers = #tpu.dot_dimension_numbers<[1], [0], [0], [1], [0, 0, 1, 1], [], []>} : vector<2x32xf32>, vector<32x32xf32>, vector<2x32xf32> -> vector<2x32xf32>
    %c2_27 = arith.constant 2 : index
    %c0_28 = arith.constant 0 : index
    %44 = vector.load %arg4[%c2_27, %c0_28] : memref<3x32xf32, #tpu.memory_space<vmem>>, vector<1x32xf32>
    %45 = vector.broadcast %44 : vector<1x32xf32> to vector<2x32xf32>
    %46 = arith.addf %43, %45 : vector<2x32xf32>
    %cst_29 = arith.constant 0.000000e+00 : f32
    %47 = vector.broadcast %cst_29 : f32 to vector<2x32xf32>
    %48 = arith.maximumf %46, %47 : vector<2x32xf32>
    %c0_30 = arith.constant 0 : index
    %c0_31 = arith.constant 0 : index
    %49 = vector.load %arg5[%c0_30, %c0_31] : memref<32x16xf32, #tpu.memory_space<vmem>>, vector<32x16xf32>
    %cst_32 = arith.constant dense<0.000000e+00> : vector<2x16xf32>
    %50 = tpu.matmul %48, %49, %cst_32 {dimension_numbers = #tpu.dot_dimension_numbers<[1], [0], [0], [1], [0, 0, 1, 1], [], []>} : vector<2x32xf32>, vector<32x16xf32>, vector<2x16xf32> -> vector<2x16xf32>
    %c0_33 = arith.constant 0 : index
    %c0_34 = arith.constant 0 : index
    %51 = vector.load %arg6[%c0_33, %c0_34] : memref<1x16xf32, #tpu.memory_space<vmem>>, vector<1x16xf32>
    %52 = vector.broadcast %51 : vector<1x16xf32> to vector<2x16xf32>
    %53 = arith.addf %50, %52 : vector<2x16xf32>
    %54 = tpu.iota {dimensions = array<i32: 1>} : vector<2x16xi32>
    %c4_i32 = arith.constant 4 : i32
    %55 = vector.broadcast %c4_i32 : i32 to vector<2x16xi32>
    %56 = arith.cmpi sge, %54, %55 : vector<2x16xi32>
    %c8_i32 = arith.constant 8 : i32
    %57 = vector.broadcast %c8_i32 : i32 to vector<2x16xi32>
    %58 = arith.cmpi slt, %54, %57 : vector<2x16xi32>
    %59 = arith.andi %56, %58 : vector<2x16xi1>
    %60 = math.exp %53 : vector<2x16xf32>
    %61 = arith.select %59, %60, %53 : vector<2x16xi1>, vector<2x16xf32>
    %c0_35 = arith.constant 0 : index
    %c0_36 = arith.constant 0 : index
    %62 = vector.load %arg7[%c0_35, %c0_36] : memref<2x16xf32, #tpu.memory_space<vmem>>, vector<2x16xf32>
    tpu.vector_store %arg7[%c0_35, %c0_36], %61 {strides = array<i32>} : memref<2x16xf32, #tpu.memory_space<vmem>>, vector<2x16xf32>,
    return
  }
  func.func @transform_0(%arg0: i32) -> (i32, i32, i32) {
    %c0_i32 = arith.constant 0 : i32
    %c0_i32_0 = arith.constant 0 : i32
    %c0_i32_1 = arith.constant 0 : i32
    return %c0_i32, %arg0, %c0_i32_0 : i32, i32, i32
  }
  func.func @transform_1(%arg0: i32) -> (i32, i32) {
    %c0_i32 = arith.constant 0 : i32
    %c0_i32_0 = arith.constant 0 : i32
    %c0_i32_1 = arith.constant 0 : i32
    return %c0_i32, %c0_i32_0 : i32, i32
  }
  func.func @transform_2(%arg0: i32) -> (i32, i32, i32) {
    %c0_i32 = arith.constant 0 : i32
    %c0_i32_0 = arith.constant 0 : i32
    %c0_i32_1 = arith.constant 0 : i32
    %c0_i32_2 = arith.constant 0 : i32
    return %c0_i32, %c0_i32_0, %c0_i32_1 : i32, i32, i32
  }
  func.func @transform_3(%arg0: i32) -> (i32, i32) {
    %c0_i32 = arith.constant 0 : i32
    %c0_i32_0 = arith.constant 0 : i32
    %c0_i32_1 = arith.constant 0 : i32
    return %c0_i32, %c0_i32_0 : i32, i32
  }
  func.func @transform_4(%arg0: i32) -> (i32, i32) {
    %c0_i32 = arith.constant 0 : i32
    %c0_i32_0 = arith.constant 0 : i32
    %c0_i32_1 = arith.constant 0 : i32
    return %c0_i32, %c0_i32_0 : i32, i32
  }
  func.func @transform_5(%arg0: i32) -> (i32, i32) {
    %c0_i32 = arith.constant 0 : i32
    %c0_i32_0 = arith.constant 0 : i32
    %c0_i32_1 = arith.constant 0 : i32
    return %c0_i32, %c0_i32_0 : i32, i32
  }
  func.func @transform_6(%arg0: i32) -> (i32, i32) {
    %c0_i32 = arith.constant 0 : i32
    %c0_i32_0 = arith.constant 0 : i32
    return %arg0, %c0_i32 : i32, i32
  }
}

</mosaic_0001>

<bundles_post_ra>
// kernel: tpu_custom_call.1
= control target key start
LH: loop header
LB: loop body
LE: loop exit
PB: predicated region body
PF: predicated region fallthrough
CT: control target
= control target key end

     0   :  { %11 = vsyncpa [#allocation3], 0  ;;  %s781_s0 = inlined_call_operand.vmem [shape: s32[3,2,1], index: 0, kind: input, shape index: {}]   ;;  %s782_s1 = inlined_call_operand.vmem [shape: f32[24,32], index: 1, kind: input, shape index: {}]   ;;  %s783_s2 = inlined_call_operand.hbm [shape: f32[3,32,32], index: 2, kind: input, shape index: {}]   ;;  %s784_s3 = inlined_call_operand.vmem [shape: f32[3,32], index: 3, kind: input, shape index: {}]   ;;  %s785_s4 = inlined_call_operand.vmem [shape: f32[32,16], index: 4, kind: input, shape index: {}]   ;;  %s786_s5 = inlined_call_operand.vmem [shape: f32[1,16], index: 5, kind: input, shape index: {}]   ;;  %s787_s6 = inlined_call_operand.hbm [shape: f32[2,16], index: 6, kind: output, shape index: {}]  }
   0x1   :  { %12 = vsyncpa [#allocation4], 0  ;;  %s648_s21 = smov [#allocation2]  }
   0x2   :  { %s22_s22 = sshll.u32 %s648_s21, 4  ;;  %s23_s22 = int_to_ptr.vmem [resolvable:$true] %s22_s22 }
   0x3   :  { %s612_s23 = scalar_lea.vmem %s23_s22, 1536  ;;  %p617_p1 = scmp.lt.s32.totalorder %s23_s22, %s23_s22 }
   0x4   :  { %p613_p0 = scmp.ne.s32.totalorder %s23_s22, %s612_s23  ;;  %p618_p2 = scmp.lt.s32.totalorder %s612_s23, %s612_s23 }
   0x6   :  { %p619_p3 = por %p618_p2, %p617_p1 }
   0x8   :  { %p620_p4 = pnand %p619_p3, %p613_p0 }
   0xa   :  { %623 = shalt.err (!%p620_p4)
}
   0xb   :  { %s649_s24 = smov 128   ;;  %s650_s25 = smov 8  }
   0xc   :  { %28 = dma.hbm_to_vmem [thread:$0]  %s783_s2, 1536, %s23_s22, [#allocation3], %s649_s24, %s649_s24, %s650_s25  }
   0xd   :  { %644 = dma.done.wait [#allocation3], 1536  }
   0xe   :  { %645 = vsyncadd [#allocation3], 4294965760  ;;  %v651_v0 = vmov 0   ;;  %v652_v1 = vmov 0.0   ;;  %v40_v2 = vld [vmem:[%s781_s0] sm:$0x3]  ;;  %v38_v11 = vlaneseq }
   0xf   :  { %600 = vset.pattern.permute.xlu0 %v651_v0  ;;  %601 = vset.pattern.permute.xlu1 %v651_v0  ;;  %v505_v3 = vld [vmem:[%s781_s0 + $0x4] sm:$0x3]  ;;  %v68_v4 = vld [vmem:[%s782_s1 + $0x10] sm:$0xff]  ;;  %v503_v5 = vld [vmem:[%s781_s0 + $0x2] sm:$0x3]  ;;  %vm653_vm0 = vmmov 0  }
  0x10   :  { %540 = vmatprep.subr.mxu0 %v652_v1  ;;  %549 = vmatprep.subr.mxu1 %v652_v1  ;;  %v67_v6 = vld [vmem:[%s782_s1 + $0x8] sm:$0xff]  ;;  %v66_v7 = vld [vmem:[%s782_s1] sm:$0xff]  ;;  %v146_v8 = vld [vmem:[#allocation2 + $0x18] sm:$0xff]  ;;  %v723_v12 = vand.u32 127, %v38_v11  ;;  %vm69_vm4 = vcmask 195584   ;;  %vm152_vm5 = vcmask 261120  }
  0x11   :  { %42 = vperm.xlu0 %600, %v40_v2   ;;  %60 = vperm.xlu1 %601, %v505_v3   ;;  %v145_v9 = vld [vmem:[#allocation2 + $0x10] sm:$0xff]  ;;  %v144_v10 = vld [vmem:[#allocation2 + $0x8] sm:$0xff]  ;;  %v143_v21 = vld [vmem:[#allocation2] sm:$0xff]  ;;  %vm485_vm9 = vcmask 123904  }
  0x12   :  { %541 = vmatpush3.msra.mxu0 %v68_v4  ;;  %546 = vmatprep.mubr.msk.f32.mxu0 %vm653_vm0, %v652_v1  ;;  %v231_v22 = vld [vmem:[#allocation2 + $0x38] sm:$0xff]  ;;  %v230_v25 = vld [vmem:[#allocation2 + $0x30] sm:$0xff]  ;;  %v229_v26 = vld [vmem:[#allocation2 + $0x28] sm:$0xff]  ;;  %vm479_vm6 = vcmp.ge.s32.totalorder %v723_v12, 4  ;;  %vm480_vm7 = vcmp.lt.s32.totalorder %v723_v12, 8 }
  0x13   :  { %542 = vmatprep.subr.mxu0 %v652_v1  ;;  %557 = vmatprep.mubr.msk.f32.mxu1 %vm653_vm0, %v652_v1  ;;  %v228_v27 = vld [vmem:[#allocation2 + $0x20] sm:$0xff]  ;;  %v315_v28 = vld [vmem:[#allocation2 + $0x58] sm:$0xff]  ;;  %v314_v34 = vld [vmem:[#allocation2 + $0x50] sm:$0xff] }
  0x14   :  { %543 = vmatpush3.msra.mxu0 %v67_v6  ;;  %550 = vmatpush3.msra.mxu1 %v146_v8  ;;  %v508_v29 = vld [vmem:[%s784_s3] ss:$0 sm:$0xff]  ;;  %v313_v35 = vld [vmem:[#allocation2 + $0x48] sm:$0xff]  ;;  %v398_v37 = vld [vmem:[%s785_s4 + $0x18] sm:$0xff] }
  0x15   :  { %51 = vperm.xlu0 %600, %v503_v5   ;;  %544 = vmatprep.subr.mxu0 %v652_v1  ;;  %v312_v36 = vld [vmem:[#allocation2 + $0x40] sm:$0xff]  ;;  %v397_v43 = vld [vmem:[%s785_s4 + $0x10] sm:$0xff]  ;;  %v396_v44 = vld [vmem:[%s785_s4 + $0x8] sm:$0xff] }
  0x16   :  { %545 = vmatpush3.msra.mxu0 %v66_v7  ;;  %551 = vmatprep.subr.mxu1 %v652_v1  ;;  %v510_v38 = vld [vmem:[%s784_s3 + $0x1] ss:$0 sm:$0xff]  ;;  %v512_v46 = vld [vmem:[%s784_s3 + $0x2] ss:$0 sm:$0xff]  ;;  %v514_v51 = vld [vmem:[%s786_s5] ss:$0 sm:$0xff] }
  0x17   :  { %560 = vmatprep.subr.mxu0 %v652_v1  ;;  %552 = vmatpush3.msra.mxu1 %v145_v9  ;;  %v395_v45 = vld [vmem:[%s785_s4] sm:$0xff]  ;;  %s654_s3 = smov [#allocation5]   ;;  %vm481_vm8 = vmand %vm479_vm6, %vm480_vm7 }
  0x18   :  { %553 = vmatprep.subr.mxu1 %v652_v1  ;;  %s493_s4 = sshll.u32 %s654_s3, 4  ;;  %s494_s4 = int_to_ptr.vmem [resolvable:$true] %s493_s4 }
  0x19   :  { %554 = vmatpush3.msra.mxu1 %v144_v10  ;;  %s624_s29 = scalar_lea.vmem %s494_s4, 32  ;;  %p629_p6 = scmp.lt.s32.totalorder %s494_s4, %s494_s4 }
  0x1a   :  { %555 = vmatprep.subr.mxu1 %v652_v1  ;;  %p625_p5 = scmp.ne.s32.totalorder %s494_s4, %s624_s29  ;;  %p630_p7 = scmp.lt.s32.totalorder %s624_s29, %s624_s29 }
  0x1b   :  { %556 = vmatpush3.msra.mxu1 %v143_v21 }
  0x1c   :  { %571 = vmatprep.subr.mxu1 %v652_v1  ;;  %p631_p8 = por %p630_p7, %p629_p6 }
  0x1e   :  { %p632_p9 = pnand %p631_p8, %p625_p5 }
  0x8c   :  { %v43_v13 = vpop.permute.xlu0 %42  ;;  %v61_v14 = vpop.permute.xlu1 %60 }
  0x8d   :  { %vm44_vm1 = vcmp.eq.s32.totalorder %v43_v13, %v723_v12  ;;  %vm62_vm2 = vcmp.eq.s32.totalorder %v61_v14, %v723_v12 }
  0x8e   :  { %v502_v16 = vsel %vm44_vm1, 1.0, %v652_v1  ;;  %v506_v18 = vsel %vm62_vm2, 1.0, %v652_v1 }
  0x90   :  { %v52_v15 = vpop.permute.xlu0 %51 }
  0x91   :  { %vm53_vm3 = vcmp.eq.s32.totalorder %v52_v15, %v723_v12 }
  0x92   :  { %v504_v17 = vsel %vm53_vm3, 1.0, %v652_v1 }
  0x93   :  { %v56_v19 = vadd.f32 %v504_v17, %v502_v16 }
  0x95   :  { %v65_v20 = vadd.f32 %v506_v18, %v56_v19 }
  0x97   :  { %547 = vmatmul.mubr.msk.f32.vlgmr.msra.gmra.mxu0 %vm69_vm4, %v65_v20 }
  0x98   :  { %568 = vmatprep.mubr.msk.f32.mxu0 %vm653_vm0, %v652_v1  ;;  %561 = vmatpush3.msra.mxu0 %v231_v22 }
  0x99   :  { %562 = vmatprep.subr.mxu0 %v652_v1 }
  0x9a   :  { %563 = vmatpush3.msra.mxu0 %v230_v25 }
  0x9b   :  { %564 = vmatprep.subr.mxu0 %v652_v1 }
  0x9c   :  { %565 = vmatpush3.msra.mxu0 %v229_v26 }
  0x9d   :  { %566 = vmatprep.subr.mxu0 %v652_v1 }
  0x9e   :  { %567 = vmatpush3.msra.mxu0 %v228_v27 }
  0x9f   :  { %582 = vmatprep.subr.mxu0 %v652_v1 }
 0x157   :  { %v139_v23 = vpop.f32.mrf.mxu0 }
 0x158   :  { %558 = vmatmul.mubr.msk.f32.vlgmr.msra.gmra.mxu1 %vm152_vm5, %v139_v23 }
 0x159   :  { %v548_v24 = vpop.f32.mrf.mxu0  ;;  %579 = vmatprep.mubr.msk.f32.mxu1 %vm653_vm0, %v652_v1  ;;  %572 = vmatpush3.msra.mxu1 %v315_v28 }
 0x15a   :  { %573 = vmatprep.subr.mxu1 %v652_v1 }
 0x15b   :  { %574 = vmatpush3.msra.mxu1 %v314_v34 }
 0x15c   :  { %575 = vmatprep.subr.mxu1 %v652_v1 }
 0x15d   :  { %576 = vmatpush3.msra.mxu1 %v313_v35 }
 0x15e   :  { %577 = vmatprep.subr.mxu1 %v652_v1 }
 0x15f   :  { %578 = vmatpush3.msra.mxu1 %v312_v36 }
 0x218   :  { %v222_v30 = vpop.f32.mrf.mxu1 }
 0x219   :  { %v223_v31 = vadd.f32 %v508_v29, %v222_v30 }
 0x21a   :  { %v559_v32 = vpop.f32.mrf.mxu1 }
 0x21b   :  { %v226_v33 = vmax.f32 %v223_v31, 0.0 }
 0x21d   :  { %569 = vmatmul.mubr.msk.f32.vlgmr.msra.gmra.mxu0 %vm152_vm5, %v226_v33 }
 0x21e   :  { %590 = vmatprep.mubr.msk.f32.mxu0 %vm653_vm0, %v652_v1  ;;  %583 = vmatpush3.msra.mxu0 %v398_v37 }
 0x21f   :  { %584 = vmatprep.subr.mxu0 %v652_v1 }
 0x220   :  { %585 = vmatpush3.msra.mxu0 %v397_v43 }
 0x221   :  { %586 = vmatprep.subr.mxu0 %v652_v1 }
 0x222   :  { %587 = vmatpush3.msra.mxu0 %v396_v44 }
 0x223   :  { %588 = vmatprep.subr.mxu0 %v652_v1 }
 0x224   :  { %589 = vmatpush3.msra.mxu0 %v395_v45 }
 0x2dd   :  { %v306_v39 = vpop.f32.mrf.mxu0 }
 0x2de   :  { %v307_v40 = vadd.f32 %v510_v38, %v306_v39 }
 0x2df   :  { %v570_v41 = vpop.f32.mrf.mxu0 }
 0x2e0   :  { %v310_v42 = vmax.f32 %v307_v40, 0.0 }
 0x2e2   :  { %580 = vmatmul.mubr.msk.f32.vlgmr.msra.gmra.mxu1 %vm152_vm5, %v310_v42 }
 0x3a2   :  { %v390_v47 = vpop.f32.mrf.mxu1 }
 0x3a3   :  { %v391_v48 = vadd.f32 %v512_v46, %v390_v47 }
 0x3a4   :  { %v581_v49 = vpop.f32.mrf.mxu1 }
 0x3a5   :  { %v394_v50 = vmax.f32 %v391_v48, 0.0 }
 0x3a7   :  { %591 = vmatmul.mubr.msk.f32.vlgmr.msra.gmra.mxu0 %vm152_vm5, %v394_v50 }
 0x467   :  { %v475_v52 = vpop.f32.mrf.mxu0 }
 0x468   :  { %v476_v53 = vadd.f32 %v514_v51, %v475_v52 }
 0x469   :  { %v592_v54 = vpop.f32.mrf.mxu0 }
 0x46a   :  { %v482_v55 = vmul.f32 1.442695, %v476_v53 }
 0x46c   :  { %602 = vpow2.f32 %v482_v55 }
 0x479   :  { %v603_v56 = vpop.eup %602 }
 0x47a   :  { %v484_v57 = vsel %vm481_vm8, %v603_v56, %v476_v53 }
 0x47b   :  { %486 = vst.msk [vmem:[#allocation5] sm:$0x3] %vm485_vm9, %v484_v57 }
 0x47c   :  { %635 = shalt.err (!%p632_p9)
}
 0x47d   :  { %496 = dma.vmem_to_hbm [thread:$0]  %s494_s4, 32, %s787_s6, [#allocation4]  }
 0x47e   :  { %646 = dma.done.wait [#allocation4], 32  }
 0x47f   :  { %647 = vsyncadd [#allocation4], 4294967264 }
 0x480   :  { %500 = vsyncpa [#allocation3], 1 }
 0x481   :  { %501 = vsyncpa [#allocation4], 1 }

</bundles_post_ra>
